<compile_context>
chip_gen: v5e
topology: v5e:2x2
jax: 0.10.0
libtpu: 0.0.40
codegen_flags: <defaults>
</compile_context>

<pallas_src>
import math
import functools

import jax
import jax.numpy as jnp
from jax import lax
from jax.experimental import pallas as pl
from jax.experimental.pallas import tpu as pltpu


def _round_up(x, m):
    return ((x + m - 1) // m) * m


def _phys_bytes_2d(rows, cols, itemsize, sublane=8):
    """Physical VMEM footprint of a 2-D block (sublane/lane padded)."""
    return _round_up(rows, sublane) * _round_up(cols, 128) * itemsize


def _rff_kernel(inv_leng_ref, x_ref, w_ref, o_ref, *, sqrt_2_D, tn, freqs_resident):
    # inv_leng_ref : SMEM (1, 1)            -> 1 / exp(logleng)
    # x_ref        : VMEM (tm, dim)          row tile of X
    # w_ref        : VMEM (dim, F_p) resident OR (dim, tn) tile of freqs^T
    # o_ref        : VMEM (tm, tn)           output tile
    inv_leng = inv_leng_ref[0, 0]

    # Fold the scalar lengthscale into the small operand (tm*dim elements).
    x = x_ref[...] * inv_leng

    if freqs_resident:
        j = pl.program_id(1)
        start = pl.multiple_of(j * tn, tn)
        w = w_ref[:, pl.ds(start, tn)]            # (dim, tn) lane slice
    else:
        w = w_ref[...]                            # (dim, tn) tile

    # Plain (tm, K) x (K, tn) matmul on the MXU, f32 accumulation.
    wx = lax.dot_general(
        x, w,
        dimension_numbers=(((1,), (0,)), ((), ())),
        preferred_element_type=jnp.float32,
    )

    o_ref[...] = (jnp.cos(wx - math.pi / 4.0) * sqrt_2_D).astype(o_ref.dtype)


def rff_forward(x, freqs, logleng, *, tm=512, tn=1024, out_dtype=None):
    """Pallas RFF forward.

    x       : (N, dim) float32
    freqs   : (nfeatures, dim) float32 (same layout as the PyTorch module)
    logleng : scalar float (log lengthscale)
    returns : (N, nfeatures) in out_dtype (default x.dtype; jnp.bfloat16 is the
              recommended fast path on writeback-bound v5e/v6e)
    """
    N, dim = x.shape
    nfeat, dim_w = freqs.shape
    assert dim == dim_w
    out_dtype = x.dtype if out_dtype is None else jnp.dtype(out_dtype)
    out_itemsize = jnp.dtype(out_dtype).itemsize
    sub = 16 if out_itemsize == 2 else 8          # bf16 min tile is (16, 128)

    # Effective tile sizes: (sub, 128)-legal, never larger than the padded
    # problem extents.
    tm_eff = min(_round_up(tm, sub), _round_up(N, sub))
    tn_eff = min(_round_up(tn, 128), _round_up(nfeat, 128))
    N_p = _round_up(N, tm_eff)
    F_p = _round_up(nfeat, tn_eff)

    x_p = x if N_p == N else jnp.pad(x, ((0, N_p - N), (0, 0)))
    # One-time XLA transpose: freqs^T is (dim, F_p), lane-dense on the feature axis.
    f_t = jnp.transpose(freqs)
    f_t = f_t if F_p == nfeat else jnp.pad(f_t, ((0, 0), (0, F_p - nfeat)))

    sqrt_2_D = math.sqrt(2.0 / nfeat)             # uses the *unpadded* nfeatures
    inv_leng = jnp.exp(-jnp.asarray(logleng, jnp.float32)).reshape(1, 1)

    # Resident-freqs decision on the PHYSICAL (padded) footprint, single buffer.
    freqs_phys = _phys_bytes_2d(dim, F_p, 4)
    freqs_resident = freqs_phys <= (16 << 20)
    if freqs_resident:
        freqs_spec = pl.BlockSpec(
            (dim, F_p), lambda i, j: (0, 0), pipeline_mode=pl.Buffered(1)
        )
        freqs_vmem = freqs_phys                   # 1 buffer, fetched once
    else:
        freqs_spec = pl.BlockSpec((dim, tn_eff), lambda i, j: (0, j))
        freqs_vmem = 2 * _phys_bytes_2d(dim, tn_eff, 4)

    # Explicit scoped-VMEM budget from the actual buffers (+ slack), clamped to
    # stay safe on v7x (64 MiB per TC) while lifting v5e's 16 MiB default.
    x_tile_vmem = 2 * _phys_bytes_2d(tm_eff, dim, 4)
    out_tile_vmem = 2 * _phys_bytes_2d(tm_eff, tn_eff, out_itemsize, sublane=sub)
    needed = freqs_vmem + x_tile_vmem + out_tile_vmem + (2 << 20)
    vmem_limit = int(min(max(needed, 32 << 20), 56 << 20))

    kernel = functools.partial(
        _rff_kernel, sqrt_2_D=sqrt_2_D, tn=tn_eff, freqs_resident=freqs_resident
    )

    cost = pl.CostEstimate(
        flops=2 * N_p * dim * F_p,
        transcendentals=N_p * F_p,
        bytes_accessed=4 * (N_p * dim + F_p * dim) + out_itemsize * N_p * F_p,
    )

    out = pl.pallas_call(
        kernel,
        out_shape=jax.ShapeDtypeStruct((N_p, F_p), out_dtype),
        grid_spec=pltpu.PrefetchScalarGridSpec(
            num_scalar_prefetch=0,
            grid=(N_p // tm_eff, F_p // tn_eff),
            in_specs=[
                # scalar 1/lengthscale, shared by every grid point
                pl.BlockSpec(memory_space=pltpu.MemorySpace.SMEM),
                # X row-tile: depends only on grid axis 0 (re-fetched per i only)
                pl.BlockSpec((tm_eff, dim), lambda i, j: (i, 0)),
                # freqs^T: resident full block (single-buffered) or per-j tile
                freqs_spec,
            ],
            out_specs=pl.BlockSpec((tm_eff, tn_eff), lambda i, j: (i, j)),
        ),
        compiler_params=pltpu.CompilerParams(
            dimension_semantics=("parallel", "parallel"),
            vmem_limit_bytes=vmem_limit,
        ),
        cost_estimate=cost,
    )(inv_leng, x_p, f_t)

    if N_p != N or F_p != nfeat:
        out = out[:N, :nfeat]
    return out


def rff_reference(x, freqs, logleng):
    nfeat = freqs.shape[0]
    w = freqs / jnp.exp(logleng)
    wx = x @ w.T
    return jnp.cos(wx - math.pi / 4.0) * math.sqrt(2.0 / nfeat)


if __name__ == "__main__":
    # Module shapes: RFF(dim, nfeatures, leng) -> freqs ~ N(0,1) of (nfeatures, dim)
    N, dim, nfeatures = 16, 32, 256
    leng = 1.5

    key = jax.random.PRNGKey(0)
    kx, kf = jax.random.split(key)
    x = jax.random.normal(kx, (N, dim), dtype=jnp.float32)
    # deterministic stand-in for torch.randn(nfeatures, dim)
    freqs = jax.random.normal(kf, (nfeatures, dim), dtype=jnp.float32)
    logleng = jnp.asarray(math.log(leng), jnp.float32)

    out = jax.block_until_ready(rff_forward(x, freqs, logleng))
    ref = rff_reference(x, freqs, logleng)
    assert out.shape == (N, nfeatures)
    assert jnp.allclose(out, ref, atol=1e-5, rtol=1e-5), "mismatch vs reference"

    # Ragged + multi-tile grid (exercises padding, per-j lane slicing of the
    # resident freqs block, and result slicing).
    N2, nfeat2 = 300, 384
    x2 = jax.random.normal(kx, (N2, dim), dtype=jnp.float32)
    f2 = jax.random.normal(kf, (nfeat2, dim), dtype=jnp.float32)
    out2 = jax.block_until_ready(rff_forward(x2, f2, logleng, tm=128, tn=128))
    ref2 = rff_reference(x2, f2, logleng)
    assert out2.shape == (N2, nfeat2)
    assert jnp.allclose(out2, ref2, atol=1e-5, rtol=1e-5), "ragged mismatch"

    # bf16-output fast path (halves HBM writeback on v5e/v6e).
    out3 = jax.block_until_ready(
        rff_forward(x2, f2, logleng, out_dtype=jnp.bfloat16)
    )
    assert out3.dtype == jnp.bfloat16
    assert jnp.allclose(out3.astype(jnp.float32), ref2, atol=2e-2, rtol=2e-2), \
        "bf16 mismatch"

    print("KERNEL_OK")
</pallas_src>

<mosaic_0001>
module attributes {stable_mosaic.version = 11 : i64} {
  func.func @_rff_kernel(%arg0: i32, %arg1: i32, %arg2: memref<1x1xf32, #tpu.memory_space<smem>>, %arg3: memref<16x32xf32, #tpu.memory_space<vmem>>, %arg4: memref<32x256xf32, #tpu.memory_space<vmem>>, %arg5: memref<16x256xf32, #tpu.memory_space<vmem>>) attributes {dimension_semantics = [#tpu.dimension_semantics<parallel>, #tpu.dimension_semantics<parallel>], iteration_bounds = array<i64: 1, 1>, scalar_prefetch = 0 : i64, scratch_operands = 0 : i64, tpu.core_type = #tpu.core_type<tc>, window_params = [{transform_indices = @transform_0, window_bounds = array<i64: 1, 1>}, {transform_indices = @transform_1, window_bounds = array<i64: 16, 32>}, {pipeline_mode = #tpu.pipeline_mode<synchronous>, transform_indices = @transform_2, window_bounds = array<i64: 32, 256>}, {transform_indices = @transform_3, window_bounds = array<i64: 16, 256>}]} {
    %c0 = arith.constant 0 : index
    %c0_0 = arith.constant 0 : index
    %0 = memref.load %arg2[%c0, %c0_0] : memref<1x1xf32, #tpu.memory_space<smem>>
    %c0_1 = arith.constant 0 : index
    %c0_2 = arith.constant 0 : index
    %1 = vector.load %arg3[%c0_1, %c0_2] : memref<16x32xf32, #tpu.memory_space<vmem>>, vector<16x32xf32>
    %2 = vector.broadcast %0 : f32 to vector<16x32xf32>
    %3 = arith.mulf %1, %2 : vector<16x32xf32>
    %c256_i32 = arith.constant 256 : i32
    %4 = arith.muli %arg1, %c256_i32 : i32
    %5 = tpu.assume_multiple %4, 256 : i32
    %c0_3 = arith.constant 0 : index
    %6 = arith.index_cast %5 : i32 to index
    %7 = vector.load %arg4[%c0_3, %6] : memref<32x256xf32, #tpu.memory_space<vmem>>, vector<32x256xf32>
    %cst = arith.constant dense<0.000000e+00> : vector<16x256xf32>
    %8 = tpu.matmul %3, %7, %cst {dimension_numbers = #tpu.dot_dimension_numbers<[1], [0], [0], [1], [0, 0, 1, 1], [], []>} : vector<16x32xf32>, vector<32x256xf32>, vector<16x256xf32> -> vector<16x256xf32>
    %cst_4 = arith.constant 0.785398185 : f32
    %9 = vector.broadcast %cst_4 : f32 to vector<16x256xf32>
    %10 = arith.subf %8, %9 : vector<16x256xf32>
    %11 = math.cos %10 : vector<16x256xf32>
    %cst_5 = arith.constant 0.0883883461 : f32
    %12 = vector.broadcast %cst_5 : f32 to vector<16x256xf32>
    %13 = arith.mulf %11, %12 : vector<16x256xf32>
    %c0_6 = arith.constant 0 : index
    %c0_7 = arith.constant 0 : index
    %14 = vector.load %arg5[%c0_6, %c0_7] : memref<16x256xf32, #tpu.memory_space<vmem>>, vector<16x256xf32>
    tpu.vector_store %arg5[%c0_6, %c0_7], %13 {strides = array<i32>} : memref<16x256xf32, #tpu.memory_space<vmem>>, vector<16x256xf32>,
    return
  }
  func.func @transform_0(%arg0: i32, %arg1: i32) -> (i32, i32) {
    %c0_i32 = arith.constant 0 : i32
    %c0_i32_0 = arith.constant 0 : i32
    %c0_i32_1 = arith.constant 0 : i32
    return %c0_i32, %c0_i32_0 : i32, i32
  }
  func.func @transform_1(%arg0: i32, %arg1: i32) -> (i32, i32) {
    %c0_i32 = arith.constant 0 : i32
    %c0_i32_0 = arith.constant 0 : i32
    return %arg0, %c0_i32 : i32, i32
  }
  func.func @transform_2(%arg0: i32, %arg1: i32) -> (i32, i32) {
    %c0_i32 = arith.constant 0 : i32
    %c0_i32_0 = arith.constant 0 : i32
    %c0_i32_1 = arith.constant 0 : i32
    return %c0_i32, %c0_i32_0 : i32, i32
  }
  func.func @transform_3(%arg0: i32, %arg1: i32) -> (i32, i32) {
    %c0_i32 = arith.constant 0 : i32
    return %arg0, %arg1 : i32, i32
  }
}

</mosaic_0001>

<bundles_post_ra>
// kernel: tpu_custom_call.1
= control target key start
LH: loop header
LB: loop body
LE: loop exit
PB: predicated region body
PF: predicated region fallthrough
CT: control target
= control target key end

     0   :  { %9 = vsyncpa [#allocation4], 0  ;;  %s1369_s0 = inlined_call_operand.<no memory space> [shape: f32[1,1], index: 0, kind: input, shape index: {}]   ;;  %s1370_s1 = inlined_call_operand.hbm [shape: f32[16,32], index: 1, kind: input, shape index: {}]   ;;  %s1371_s2 = inlined_call_operand.hbm [shape: f32[32,256], index: 2, kind: input, shape index: {}]   ;;  %s1372_s3 = inlined_call_operand.hbm [shape: f32[16,256], index: 3, kind: output, shape index: {}]  }
   0x1   :  { %10 = vsyncpa [#allocation7], 0 }
   0x2   :  { %11 = vsyncpa [#allocation5], 0  ;;  %s18_s14 = sshll.u32 %s1370_s1, 4  ;;  %s890_s15 = smov [#allocation3]   ;;  %s19_s14 = int_to_ptr.hbm [resolvable:$true] %s18_s14 }
   0x3   :  { %s20_s16 = sshll.u32 %s890_s15, 4  ;;  %s31_s19 = sshll.u32 %s1371_s2, 4  ;;  %s21_s16 = int_to_ptr.vmem [resolvable:$true] %s20_s16  ;;  %s32_s19 = int_to_ptr.hbm [resolvable:$true] %s31_s19 }
   0x4   :  { %s891_s20 = smov 128   ;;  %s892_s21 = smov 8  }
   0x5   :  { %26 = dma.hbm_to_vmem [thread:$0]  %s19_s14, 256, %s21_s16, [#allocation4], %s891_s20, %s891_s20, %s892_s21  }
   0x6   :  { %s893_s22 = smov [#allocation6]   ;;  %s894_s24 = smov 256  }
   0x7   :  { %s33_s23 = sshll.u32 %s893_s22, 4  ;;  %s895_s25 = smov 16   ;;  %s34_s23 = int_to_ptr.vmem [resolvable:$true] %s33_s23 }
   0x8   :  { %39 = dma.hbm_to_vmem [thread:$0]  %s32_s19, 1024, %s34_s23, [#allocation7], %s894_s24, %s894_s24, %s895_s25  }
   0x9   :  { %884 = dma.done.wait [#allocation4], 256  }
   0xa   :  { %885 = vsyncadd [#allocation4], 4294967040 }
   0xb   :  { %886 = dma.done.wait [#allocation7], 1024  }
   0xc   :  { %887 = vsyncadd [#allocation7], 4294966272  ;;  %v65_v0 = vld [vmem:[#allocation6 + $0x30] sm:$0xff]  ;;  %v66_v1 = vld [vmem:[#allocation6 + $0x38] sm:$0xff]  ;;  %v51_v6 = vstv %s1369_s0  ;;  %vm67_vm0 = vcmask 261120   ;;  %s903_s0 = smov [#allocation8]  }
   0xd   :  { %v63_v2 = vld [vmem:[#allocation6 + $0x20] sm:$0xff]  ;;  %86 = vmatpush.msra.mxu0 %v65_v0  ;;  %790 = vmatpush.msra.mxu2 %v65_v0  ;;  %v64_v3 = vld [vmem:[#allocation6 + $0x28] sm:$0xff]  ;;  %v61_v4 = vld [vmem:[#allocation6 + $0x10] sm:$0xff]  ;;  %v896_v40 = vmov 683565275   ;;  %s752_s26 = sshll.u32 %s903_s0, 4  ;;  %s753_s26 = int_to_ptr.vmem [resolvable:$true] %s752_s26 }
   0xe   :  { %109 = vmatpush.msra.mxu1 %v66_v1  ;;  %794 = vmatpush.msra.mxu3 %v66_v1  ;;  %v49_v5 = vld [vmem:[#allocation3] sm:$0xff]  ;;  %v62_v7 = vld [vmem:[#allocation6 + $0x18] sm:$0xff]  ;;  %v59_v9 = vld [vmem:[#allocation6] sm:$0xff]  ;;  %v897_v42 = vmov 2475754826   ;;  %s754_s29 = sshll.u32 %s1372_s3, 4  ;;  %s755_s29 = int_to_ptr.hbm [resolvable:$true] %s754_s29 }
   0xf   :  { %87 = vmatpush.msra.mxu0 %v63_v2  ;;  %791 = vmatpush.msra.mxu2 %v63_v2  ;;  %v50_v8 = vld [vmem:[#allocation3 + $0x8] sm:$0xff]  ;;  %v60_v10 = vld [vmem:[#allocation6 + $0x8] sm:$0xff]  ;;  %v52_v11 = vmul.f32 %v51_v6, %v49_v5  ;;  %v898_v44 = vmov 2131351028   ;;  %v899_v46 = vmov 2102212464  }
  0x10   :  { %110 = vmatpush.msra.mxu1 %v64_v3  ;;  %795 = vmatpush.msra.mxu3 %v64_v3  ;;  %v53_v12 = vmul.f32 %v51_v6, %v50_v8  ;;  %v900_v48 = vmov 920167782   ;;  %v901_v57 = vmov 1326507024  }
  0x11   :  { %88 = vmatpush.msra.mxu0 %v61_v4  ;;  %792 = vmatpush.msra.mxu2 %v61_v4 }
  0x12   :  { %111 = vmatpush.msra.mxu1 %v62_v7  ;;  %796 = vmatpush.msra.mxu3 %v62_v7 }
  0x13   :  { %89 = vmatpush.msra.mxu0 %v59_v9  ;;  %793 = vmatpush.msra.mxu2 %v59_v9 }
  0x14   :  { %112 = vmatpush.msra.mxu1 %v60_v10  ;;  %797 = vmatpush.msra.mxu3 %v60_v10 }
  0x15   :  { %770 = vmatmul.msk.f32.vlgmr.msra.gmra.mxu0 %vm67_vm0, %v52_v11  ;;  %771 = vmatmul.msk.f32.vlgmr.msra.gmra.mxu2 %vm67_vm0, %v53_v12 }
  0x16   :  { %772 = vmatmul.msk.f32.vlgmr.msra.gmra.mxu1 %vm67_vm0, %v52_v11  ;;  %773 = vmatmul.msk.f32.vlgmr.msra.gmra.mxu3 %vm67_vm0, %v53_v12 }
  0x92   :  { %v91_v13 = vpop.f32.mrf.mxu0 }
  0x93   :  { %v936_v14 = vadd.f32 -0.7853982, %v91_v13  ;;  %v114_v15 = vpop.f32.mrf.mxu1 }
  0x94   :  { %v938_v16 = vadd.f32 -0.7853982, %v114_v15 }
  0x95   :  { %v124_v17 = vand.u32 2147483647, %v936_v14  ;;  %v127_v18 = vand.u32 2139095040, %v936_v14 }
  0x96   :  { %v278_v19 = vand.u32 2147483647, %v938_v16  ;;  %v281_v20 = vand.u32 2139095040, %v938_v16 }
  0x97   :  { %v128_v21 = vshrl.u32 %v127_v18, 23  ;;  %v131_v22 = vand.u32 8388607, %v124_v17 }
  0x98   :  { %v282_v23 = vshrl.u32 %v281_v20, 23  ;;  %v285_v26 = vand.u32 8388607, %v278_v19  ;;  %v94_v29 = vpop.f32.mrf.mxu2 }
  0x99   :  { %v778_v24 = vadd.s32 4294967169, %v128_v21  ;;  %v132_v27 = vor.u32 8388608, %v131_v22  ;;  %v948_v33 = vadd.f32 -0.7853982, %v94_v29 }
  0x9a   :  { %v781_v25 = vadd.s32 4294967169, %v282_v23  ;;  %v286_v32 = vor.u32 8388608, %v285_v26 }
  0x9b   :  { %v134_v28 = vadd.s32 1, %v778_v24  ;;  %v950_v35 = vshll.u32 %v132_v27, 8  ;;  %v435_v51 = vand.u32 2139095040, %v948_v33 }
  0x9c   :  { %v288_v30 = vadd.s32 1, %v781_v25  ;;  %v961_v50 = vshll.u32 %v286_v32, 8 }
  0x9d   :  { %vm135_vm1 = vcmp.gt.s32.totalorder %v134_v28, 0  ;;  %v173_v55 = vand.u32 65535, %v950_v35  ;;  %v174_v1 = vshrl.u32 %v950_v35, 16 }
  0x9e   :  { %v136_v31 = vsel %vm135_vm1, %v134_v28, 0  ;;  %vm289_vm2 = vcmp.gt.s32.totalorder %v288_v30, 0  ;;  %v1006_v20 = vand.u32 65535, %v961_v50 }
  0x9f   :  { %v138_v34 = vand.u32 31, %v136_v31  ;;  %v290_v36 = vsel %vm289_vm2, %v288_v30, 0  ;;  %v952_v37 = vshrl.u32 %v136_v31, 5 }
  0xa0   :  { %v954_v38 = vand.u32 31, %v290_v36  ;;  %v1012_v27 = vshrl.u32 %v290_v36, 5 }
  0xa1   :  { %v139_v39 = vsub.s32 32, %v138_v34  ;;  %v141_v41 = vshll.u32 %v896_v40, %v138_v34  ;;  %v144_v43 = vshll.u32 %v897_v42, %v138_v34  ;;  %v147_v45 = vshll.u32 %v898_v44, %v138_v34 }
  0xa2   :  { %v150_v47 = vshll.u32 %v899_v46, %v138_v34  ;;  %v153_v49 = vshll.u32 %v900_v48, %v138_v34  ;;  %vm156_vm3 = vcmp.lt.s32.totalorder %v952_v37, 1  ;;  %vm159_vm4 = vcmp.lt.s32.totalorder %v952_v37, 4 }
  0xa3   :  { %v142_v52 = vshrl.u32 %v897_v42, %v139_v39  ;;  %v145_v53 = vshrl.u32 %v898_v44, %v139_v39  ;;  %v148_v54 = vshrl.u32 %v899_v46, %v139_v39  ;;  %v151_v56 = vshrl.u32 %v900_v48, %v139_v39 }
  0xa4   :  { %v154_v58 = vshrl.u32 %v901_v57, %v139_v39  ;;  %v973_v62 = vsub.s32 32, %v954_v38  ;;  %vm158_vm5 = vcmp.lt.s32.totalorder %v952_v37, 3  ;;  %v140_v2 = vshrl.u32 %v896_v40, %v139_v39 }
  0xa5   :  { %v143_v59 = vor.u32 %v142_v52, %v141_v41  ;;  %v146_v60 = vor.u32 %v145_v53, %v144_v43  ;;  %v149_v61 = vor.u32 %v148_v54, %v147_v45  ;;  %v152_v63 = vor.u32 %v151_v56, %v150_v47 }
  0xa6   :  { %v155_v0 = vor.u32 %v154_v58, %v153_v49  ;;  %vm157_vm6 = vcmp.lt.s32.totalorder %v952_v37, 2  ;;  %v295_v7 = vshll.u32 %v896_v40, %v954_v38  ;;  %v298_v8 = vshll.u32 %v897_v42, %v954_v38 }
  0xa7   :  { %v164_v3 = vsel %vm156_vm3, %v143_v59, %v146_v60  ;;  %v168_v4 = vsel %vm156_vm3, %v146_v60, %v149_v61  ;;  %v165_v5 = vsel %vm159_vm4, %v152_v63, 920167782  ;;  %v161_v9 = vsel %vm159_vm4, %v149_v61, 2102212464 }
  0xa8   :  { %v169_v6 = vsel %vm159_vm4, %v155_v0, 1326507024  ;;  %v166_v10 = vsel %vm158_vm5, %v149_v61, %v165_v5  ;;  %v296_v12 = vshrl.u32 %v897_v42, %v973_v62  ;;  %v299_v18 = vshrl.u32 %v898_v44, %v973_v62 }
  0xa9   :  { %v170_v11 = vsel %vm158_vm5, %v152_v63, %v169_v6  ;;  %v167_v13 = vsel %vm157_vm6, %v164_v3, %v166_v10  ;;  %v160_v25 = vsel %vm156_vm3, %v140_v2, %v143_v59  ;;  %v162_v26 = vsel %vm158_vm5, %v146_v60, %v161_v9 }
  0xaa   :  { %v171_v15 = vsel %vm157_vm6, %v168_v4, %v170_v11  ;;  %v197_v23 = vand.u32 65535, %v167_v13  ;;  %v198_v24 = vshrl.u32 %v167_v13, 16  ;;  %v1014_v28 = vor.u32 %v296_v12, %v295_v7 }
  0xab   :  { %v175_v21 = vand.u32 65535, %v171_v15  ;;  %v176_v22 = vshrl.u32 %v171_v15, 16  ;;  %v1016_v31 = vor.u32 %v299_v18, %v298_v8  ;;  %v301_v32 = vshll.u32 %v898_v44, %v954_v38 }
  0xac   :  { %v200_v39 = vmul.u32 %v198_v24, %v173_v55  ;;  %v201_v41 = vmul.u32 %v197_v23, %v174_v1  ;;  %v302_v43 = vshrl.u32 %v899_v46, %v973_v62  ;;  %v199_v49 = vmul.u32 %v197_v23, %v173_v55 }
  0xad   :  { %v178_v29 = vmul.u32 %v176_v22, %v173_v55  ;;  %v179_v30 = vmul.u32 %v175_v21, %v174_v1  ;;  %v177_v34 = vmul.u32 %v175_v21, %v173_v55  ;;  %v180_v45 = vmul.u32 %v176_v22, %v174_v1 }
  0xae   :  { %v202_v36 = vmul.u32 %v198_v24, %v174_v1  ;;  %v203_v56 = vshll.u32 %v200_v39, 16  ;;  %v205_v59 = vshll.u32 %v201_v41, 16  ;;  %v304_v60 = vshll.u32 %v899_v46, %v954_v38 }
  0xaf   :  { %v181_v47 = vshll.u32 %v178_v29, 16  ;;  %v182_v52 = vshrl.u32 %v178_v29, 16  ;;  %v183_v53 = vshll.u32 %v179_v30, 16  ;;  %v184_v54 = vshrl.u32 %v179_v30, 16 }
  0xb0   :  { %v902_v61 = vmov 0   ;;  %vm207_vm8 = vc.u32 %v199_v49, %v203_v56  ;;  %v209_v0 = vadd.s32 %v203_v56, %v199_v49  ;;  %v305_v2 = vshrl.u32 %v900_v48, %v973_v62 }
  0xb1   :  { %vm185_vm7 = vc.u32 %v177_v34, %v181_v47  ;;  %v187_v58 = vadd.s32 %v181_v47, %v177_v34  ;;  %v208_v1 = vsel %vm207_vm8, 1, %v902_v61  ;;  %v307_v3 = vshll.u32 %v900_v48, %v954_v38 }
  0xb2   :  { %v186_v63 = vsel %vm185_vm7, 1, %v902_v61  ;;  %v210_v5 = vadd.s32 %v208_v1, %v202_v36  ;;  %vm211_vm10 = vc.u32 %v209_v0, %v205_v59  ;;  %v1031_v6 = vor.u32 %v302_v43, %v301_v32 }
  0xb3   :  { %v188_v55 = vadd.s32 %v186_v63, %v180_v45  ;;  %vm189_vm9 = vc.u32 %v187_v58, %v183_v53  ;;  %v212_v8 = vsel %vm211_vm10, 1, %v902_v61  ;;  %v306_v9 = vor.u32 %v305_v2, %v304_v60 }
  0xb4   :  { %v190_v4 = vsel %vm189_vm9, 1, %v902_v61  ;;  %v308_v10 = vshrl.u32 %v901_v57, %v973_v62  ;;  %v204_v11 = vshrl.u32 %v200_v39, 16  ;;  %v214_v12 = vadd.s32 %v212_v8, %v210_v5 }
  0xb5   :  { %v192_v7 = vadd.s32 %v190_v4, %v188_v55  ;;  %vm310_vm11 = vcmp.lt.s32.totalorder %v1012_v27, 1  ;;  %vm312_vm12 = vcmp.lt.s32.totalorder %v1012_v27, 3  ;;  %v206_v13 = vshrl.u32 %v201_v41, 16 }
  0xb6   :  { %v309_v15 = vor.u32 %v308_v10, %v307_v3  ;;  %vm313_vm13 = vcmp.lt.s32.totalorder %v1012_v27, 4  ;;  %v1039_v18 = vadd.s32 %v209_v0, %v205_v59  ;;  %v215_v21 = vadd.s32 %v214_v12, %v204_v11 }
  0xb7   :  { %v193_v38 = vadd.s32 %v192_v7, %v182_v52  ;;  %v318_v22 = vsel %vm310_vm11, %v1014_v28, %v1016_v31  ;;  %v319_v23 = vsel %vm313_vm13, %v306_v9, 920167782  ;;  %vm311_vm14 = vcmp.lt.s32.totalorder %v1012_v27, 2 }
  0xb8   :  { %v320_v29 = vsel %vm312_vm12, %v1031_v6, %v319_v23  ;;  %v322_v30 = vsel %vm310_vm11, %v1016_v31, %v1031_v6  ;;  %v163_v32 = vsel %vm157_vm6, %v160_v25, %v162_v26  ;;  %v216_v34 = vadd.s32 %v215_v21, %v206_v13 }
  0xb9   :  { %v1047_v24 = vadd.s32 %v193_v38, %v184_v54  ;;  %v321_v39 = vsel %vm311_vm14, %v318_v22, %v320_v29  ;;  %v323_v41 = vsel %vm313_vm13, %v309_v15, 1326507024  ;;  %v328_v45 = vshrl.u32 %v961_v50, 16 }
  0xba   :  { %v324_v43 = vsel %vm312_vm12, %v306_v9, %v323_v41  ;;  %v351_v47 = vand.u32 65535, %v321_v39  ;;  %v220_v49 = vadd.s32 1, %v216_v34  ;;  %v352_v25 = vshrl.u32 %v321_v39, 16 }
  0xbb   :  { %vm219_vm15 = vc.u32 %v1047_v24, %v1039_v18  ;;  %v325_v37 = vsel %vm311_vm14, %v322_v30, %v324_v43  ;;  %v436_v26 = vshrl.u32 %v435_v51, 23  ;;  %v217_v36 = vmul.u32 %v950_v35, %v163_v32 }
  0xbc   :  { %v329_v52 = vand.u32 65535, %v325_v37  ;;  %v330_v53 = vshrl.u32 %v325_v37, 16  ;;  %v221_v54 = vsel %vm219_vm15, %v220_v49, %v216_v34  ;;  %v354_v56 = vmul.u32 %v352_v25, %v1006_v20 }
  0xbd   :  { %v355_v58 = vmul.u32 %v351_v47, %v328_v45  ;;  %v222_v59 = vadd.s32 %v221_v54, %v217_v36  ;;  %v353_v0 = vmul.u32 %v351_v47, %v1006_v20  ;;  %v356_v2 = vmul.u32 %v352_v25, %v328_v45 }
  0xbe   :  { %v332_v60 = vmul.u32 %v330_v53, %v1006_v20  ;;  %v333_v63 = vmul.u32 %v329_v52, %v328_v45  ;;  %v357_v55 = vshll.u32 %v354_v56, 16  ;;  %v784_v1 = vadd.s32 4294967169, %v436_v26 }
  0xbf   :  { %v223_v3 = vadd.s32 536870912, %v222_v59  ;;  %v331_v51 = vmul.u32 %v329_v52, %v1006_v20  ;;  %v334_v4 = vmul.u32 %v330_v53, %v328_v45  ;;  %v359_v7 = vshll.u32 %v355_v58, 16 }
  0xc0   :  { %v335_v35 = vshll.u32 %v332_v60, 16  ;;  %v337_v5 = vshll.u32 %v333_v63, 16  ;;  %vm361_vm0 = vc.u32 %v353_v0, %v357_v55  ;;  %v363_v8 = vadd.s32 %v357_v55, %v353_v0 }
  0xc1   :  { %v224_v9 = vshrl.u32 %v223_v3, 30  ;;  %v362_v11 = vsel %vm361_vm0, 1, %v902_v61  ;;  %v294_v12 = vshrl.u32 %v896_v40, %v973_v62  ;;  %v315_v20 = vsel %vm313_vm13, %v1031_v6, 2102212464 }
  0xc2   :  { %vm339_vm1 = vc.u32 %v331_v51, %v335_v35  ;;  %v341_v10 = vadd.s32 %v335_v35, %v331_v51  ;;  %v364_v13 = vadd.s32 %v362_v11, %v356_v2  ;;  %vm365_vm2 = vc.u32 %v363_v8, %v359_v7 }
  0xc3   :  { %v340_v38 = vsel %vm339_vm1, 1, %v902_v61  ;;  %v225_v15 = vshll.u32 %v224_v9, 30  ;;  %v366_v23 = vsel %vm365_vm2, 1, %v902_v61  ;;  %v432_v29 = vand.u32 2147483647, %v948_v33 }
  0xc4   :  { %v342_v21 = vadd.s32 %v340_v38, %v334_v4  ;;  %vm343_vm3 = vc.u32 %v341_v10, %v337_v5  ;;  %v442_v30 = vadd.s32 1, %v784_v1  ;;  %v336_v62 = vshrl.u32 %v332_v60, 16 }
  0xc5   :  { %v344_v22 = vsel %vm343_vm3, 1, %v902_v61  ;;  %v226_v32 = vsub.s32 %v222_v59, %v225_v15  ;;  %v368_v39 = vadd.s32 %v366_v23, %v364_v13  ;;  %v314_v41 = vsel %vm310_vm11, %v294_v12, %v1014_v28 }
  0xc6   :  { %v346_v34 = vadd.s32 %v344_v22, %v342_v21  ;;  %v316_v6 = vsel %vm312_vm12, %v1016_v31, %v315_v20  ;;  %v358_v43 = vshrl.u32 %v354_v56, 16  ;;  %vm443_vm4 = vcmp.gt.s32.totalorder %v442_v30, 0 }
  0xc7   :  { %vm227_vm5 = vcmp.lt.s32.totalorder %v226_v32, 0  ;;  %v228_v45 = vsub.s32 0, %v226_v32  ;;  %v338_v49 = vshrl.u32 %v333_v63, 16  ;;  %v360_v37 = vshrl.u32 %v355_v58, 16 }
  0xc8   :  { %v347_v47 = vadd.s32 %v346_v34, %v336_v62  ;;  %v369_v25 = vadd.s32 %v368_v39, %v358_v43  ;;  %v444_v26 = vsel %vm443_vm4, %v442_v30, 0  ;;  %v317_v52 = vsel %vm311_vm14, %v314_v41, %v316_v6 }
  0xc9   :  { %v229_v36 = vsel %vm227_vm5, %v228_v45, %v226_v32  ;;  %v1095_v53 = vadd.s32 %v363_v8, %v359_v7  ;;  %v439_v28 = vand.u32 8388607, %v432_v29  ;;  %v248_v31 = vsub.s32 4, %v224_v9 }
  0xca   :  { %v230_v54 = vclz %v229_v36  ;;  %v1099_v56 = vadd.s32 %v347_v47, %v338_v49  ;;  %v370_v59 = vadd.s32 %v369_v25, %v360_v37  ;;  %v446_v60 = vand.u32 31, %v444_v26 }
  0xcb   :  { %vm126_vm6 = vcmp.lt.s32.totalorder %v936_v14, 0  ;;  %v218_v27 = vadd.s32 %v1039_v18, %v1047_v24  ;;  %v371_v0 = vmul.u32 %v961_v50, %v317_v52  ;;  %v440_v2 = vor.u32 8388608, %v439_v28 }
  0xcc   :  { %v779_v58 = vadd.s32 4294967294, %v230_v54  ;;  %vm373_vm7 = vc.u32 %v1099_v56, %v1095_v53  ;;  %v374_v63 = vadd.s32 1, %v370_v59  ;;  %v447_v55 = vsub.s32 32, %v446_v60 }
  0xcd   :  { %v249_v1 = vsel %vm126_vm6, %v248_v31, %v224_v9  ;;  %v1109_v51 = vshrl.u32 %v444_v26, 5  ;;  %v449_v5 = vshll.u32 %v896_v40, %v446_v60  ;;  %v452_v18 = vshll.u32 %v897_v42, %v446_v60 }
  0xce   :  { %vm780_vm8 = vcmp.lt.s32.totalorder %v779_v58, 0  ;;  %v375_v3 = vsel %vm373_vm7, %v374_v63, %v370_v59  ;;  %v450_v7 = vshrl.u32 %v897_v42, %v447_v55  ;;  %v453_v50 = vshrl.u32 %v898_v44, %v447_v55 }
  0xcf   :  { %v233_v4 = vsel %vm780_vm8, 0, %v779_v58  ;;  %v376_v35 = vadd.s32 %v375_v3, %v371_v0  ;;  %v456_v11 = vshrl.u32 %v899_v46, %v447_v55  ;;  %v458_v9 = vshll.u32 %v899_v46, %v446_v60 }
  0xd0   :  { %v234_v8 = vsub.s32 32, %v233_v4  ;;  %v238_v10 = vsub.s32 4294967266, %v233_v4  ;;  %v459_v12 = vshrl.u32 %v900_v48, %v447_v55  ;;  %v235_v38 = vshll.u32 %v226_v32, %v233_v4 }
  0xd1   :  { %v377_v24 = vadd.s32 536870912, %v376_v35  ;;  %v462_v20 = vshrl.u32 %v901_v57, %v447_v55  ;;  %v451_v22 = vor.u32 %v450_v7, %v449_v5  ;;  %v1121_v23 = vor.u32 %v453_v50, %v452_v18 }
  0xd2   :  { %v236_v13 = vshrl.u32 %v218_v27, %v234_v8  ;;  %v239_v15 = vadd.s32 127, %v238_v10  ;;  %v455_v30 = vshll.u32 %v898_v44, %v446_v60  ;;  %v460_v39 = vor.u32 %v459_v12, %v458_v9 }
  0xd3   :  { %v1119_v21 = vshrl.u32 %v377_v24, 30  ;;  %v461_v41 = vshll.u32 %v900_v48, %v446_v60  ;;  %vm1127_vm9 = vcmp.le.f32.partialorder %v124_v17, 0.7853982  ;;  %vm464_vm10 = vcmp.lt.s32.totalorder %v1109_v51, 1 }
  0xd4   :  { %v237_v62 = vor.u32 %v236_v13, %v235_v38  ;;  %v240_v34 = vshll.u32 %v239_v15, 23  ;;  %v457_v43 = vor.u32 %v456_v11, %v455_v30  ;;  %v251_v47 = vsel %vm1127_vm9, 0, %v249_v1 }
  0xd5   :  { %v379_v6 = vshll.u32 %v1119_v21, 30  ;;  %v463_v49 = vor.u32 %v462_v20, %v461_v41  ;;  %vm467_vm11 = vcmp.lt.s32.totalorder %v1109_v51, 4  ;;  %v472_v17 = vsel %vm464_vm10, %v451_v22, %v1121_v23 }
  0xd6   :  { %v241_v45 = vor.u32 4788187, %v240_v34  ;;  %v1141_v25 = vshll.u32 %v440_v2, 8  ;;  %v244_v36 = vcvt.s32.f32 %v237_v62  ;;  %vm466_vm12 = vcmp.lt.s32.totalorder %v1109_v51, 3 }
  0xd7   :  { %v1135_v37 = vsub.s32 %v376_v35, %v379_v6  ;;  %v473_v52 = vsel %vm467_vm11, %v460_v39, 920167782  ;;  %vm465_vm14 = vcmp.lt.s32.totalorder %v1109_v51, 2  ;;  %v476_v60 = vsel %vm464_vm10, %v1121_v23, %v457_v43  ;;  %v117_v35 = vpop.f32.mrf.mxu3 }
  0xd8   :  { %v242_v26 = vand.u32 2147483647, %v241_v45  ;;  %v474_v54 = vsel %vm466_vm12, %v457_v43, %v473_v52  ;;  %v477_v58 = vsel %vm467_vm11, %v463_v49, 1326507024  ;;  %v1158_v63 = vand.u32 3, %v251_v47 }
  0xd9   :  { %vm381_vm13 = vcmp.lt.s32.totalorder %v1135_v37, 0  ;;  %v382_v28 = vsub.s32 0, %v1135_v37  ;;  %v475_v59 = vsel %vm465_vm14, %v472_v17, %v474_v54  ;;  %v481_v0 = vand.u32 65535, %v1141_v25 }
  0xda   :  { %v245_v31 = vmul.f32 %v244_v36, %v242_v26  ;;  %v478_v3 = vsel %vm466_vm12, %v460_v39, %v477_v58  ;;  %v482_v4 = vshrl.u32 %v1141_v25, 16  ;;  %v448_v5 = vshrl.u32 %v896_v40, %v447_v55 }
  0xdb   :  { %v383_v27 = vsel %vm381_vm13, %v382_v28, %v1135_v37  ;;  %v479_v7 = vsel %vm465_vm14, %v476_v60, %v478_v3  ;;  %v505_v8 = vand.u32 65535, %v475_v59  ;;  %v506_v10 = vshrl.u32 %v475_v59, 16 }
  0xdc   :  { %v246_v2 = vxor.u32 2147483648, %v245_v31  ;;  %v384_v1 = vclz %v383_v27  ;;  %v483_v24 = vand.u32 65535, %v479_v7  ;;  %v484_v11 = vshrl.u32 %v479_v7, 16 }
  0xdd   :  { %v372_v12 = vadd.s32 %v1095_v53, %v1099_v56  ;;  %v1179_v55 = vsel %vm464_vm10, %v448_v5, %v451_v22  ;;  %v1181_v38 = vadd.f32 -0.7853982, %v117_v35  ;;  %v469_v15 = vsel %vm467_vm11, %v457_v43, 2102212464 }
  0xde   :  { %v247_v18 = vsel %vm126_vm6, %v246_v2, %v245_v31  ;;  %v782_v50 = vadd.s32 4294967294, %v384_v1  ;;  %v486_v20 = vmul.u32 %v484_v11, %v481_v0  ;;  %v1187_v62 = vmul.u32 %v483_v24, %v482_v4 }
  0xdf   :  { %v1173_v9 = vsel %vm1127_vm9, %v936_v14, %v247_v18  ;;  %v507_v34 = vmul.u32 %v505_v8, %v481_v0  ;;  %v1189_v39 = vmul.u32 %v506_v10, %v481_v0  ;;  %v1191_v41 = vmul.u32 %v505_v8, %v482_v4 }
  0xe0   :  { %v252_v13 = vmul.f32 %v1173_v9, %v1173_v9  ;;  %vm783_vm15 = vcmp.lt.s32.totalorder %v782_v50, 0  ;;  %v485_v6 = vmul.u32 %v483_v24, %v481_v0  ;;  %v488_v45 = vmul.u32 %v484_v11, %v482_v4 }
  0xe1   :  { %v387_v30 = vsel %vm783_vm15, 0, %v782_v50  ;;  %v489_v47 = vshll.u32 %v486_v20, 16  ;;  %v491_v52 = vshll.u32 %v1187_v62, 16  ;;  %v511_v60 = vshll.u32 %v1189_v39, 16 }
  0xe2   :  { %v253_v53 = vmul.f32 -0.001358992, %v252_v13  ;;  %v260_v56 = vmul.f32 -0.00019511016, %v252_v13  ;;  %v388_v22 = vsub.s32 32, %v387_v30  ;;  %v392_v32 = vsub.s32 4294967266, %v387_v30 }
  0xe3   :  { %v389_v43 = vshll.u32 %v1135_v37, %v387_v30  ;;  %vm493_vm0 = vc.u32 %v485_v6, %v489_v47  ;;  %v495_v28 = vadd.s32 %v489_v47, %v485_v6  ;;  %vm280_vm2 = vcmp.lt.s32.totalorder %v938_v16, 0 }
  0xe4   :  { %v254_v49 = vadd.f32 0.041655596, %v253_v53  ;;  %v261_v17 = vadd.f32 0.008332121, %v260_v56  ;;  %v390_v26 = vshrl.u32 %v372_v12, %v388_v22  ;;  %v393_v36 = vadd.s32 127, %v392_v32 }
  0xe5   :  { %v494_v59 = vsel %vm493_vm0, 1, %v902_v61  ;;  %vm497_vm1 = vc.u32 %v495_v28, %v491_v52  ;;  %v510_v3 = vmul.u32 %v506_v10, %v482_v4  ;;  %vm270_vm3 = vcmp.eq.s32.totalorder %v1158_v63, 0 }
  0xe6   :  { %v255_v54 = vmul.f32 %v254_v49, %v252_v13  ;;  %v262_v31 = vmul.f32 %v261_v17, %v252_v13  ;;  %v391_v58 = vor.u32 %v390_v26, %v389_v43  ;;  %v394_v27 = vshll.u32 %v393_v36, 23 }
  0xe7   :  { %v496_v0 = vadd.s32 %v494_v59, %v488_v45  ;;  %v498_v37 = vsel %vm497_vm1, 1, %v902_v61  ;;  %vm1202_vm4 = vcmp.le.f32.partialorder %v278_v19, 0.7853982  ;;  %v490_v7 = vshrl.u32 %v486_v20, 16 }
  0xe8   :  { %v256_v2 = vadd.f32 -0.4999988, %v255_v54  ;;  %v263_v1 = vadd.f32 -0.16666654, %v262_v31  ;;  %v395_v5 = vor.u32 4788187, %v394_v27  ;;  %vm515_vm6 = vc.u32 %v507_v34, %v511_v60 }
  0xe9   :  { %v500_v8 = vadd.s32 %v498_v37, %v496_v0  ;;  %v513_v18 = vshll.u32 %v1191_v41, 16  ;;  %vm269_vm5 = vcmp.lt.s32.totalorder %v1158_v63, 2  ;;  %v517_v11 = vadd.s32 %v511_v60, %v507_v34 }
  0xea   :  { %v257_v50 = vmul.f32 %v256_v2, %v252_v13  ;;  %v264_v24 = vmul.f32 %v263_v1, %v252_v13  ;;  %vm267_vm7 = vweird.f32 %v936_v14  ;;  %v396_v4 = vand.u32 2147483647, %v395_v5 }
  0xeb   :  { %v398_v10 = vcvt.s32.f32 %v391_v58  ;;  %v501_v12 = vadd.s32 %v500_v8, %v490_v7  ;;  %v516_v19 = vsel %vm515_vm6, 1, %v902_v61  ;;  %vm519_vm8 = vc.u32 %v517_v11, %v513_v18 }
  0xec   :  { %v258_v30 = vadd.f32 1.0, %v257_v50  ;;  %v265_v53 = vadd.f32 1.0, %v264_v24  ;;  %v518_v56 = vadd.s32 %v516_v19, %v510_v3  ;;  %v470_v13 = vsel %vm466_vm12, %v1121_v23, %v469_v15 }
  0xed   :  { %v399_v20 = vmul.f32 %v398_v10, %v396_v4  ;;  %v492_v22 = vshrl.u32 %v1187_v62, 16  ;;  %v520_v34 = vsel %vm519_vm8, 1, %v902_v61  ;;  %v512_v45 = vshrl.u32 %v1189_v39, 16 }
  0xee   :  { %v266_v32 = vmul.f32 %v265_v53, %v1173_v9  ;;  %v274_v6 = vxor.u32 2147483648, %v258_v30  ;;  %v522_v47 = vadd.s32 %v520_v34, %v518_v56  ;;  %vm273_vm9 = vcmp.eq.s32.totalorder %v1158_v63, 2 }
  0xef   :  { %v400_v49 = vxor.u32 2147483648, %v399_v20  ;;  %v1218_v17 = vadd.s32 %v501_v12, %v492_v22  ;;  %v589_v43 = vand.u32 2139095040, %v1181_v38  ;;  %v402_v23 = vsub.s32 4, %v1119_v21 }
  0xf0   :  { %v271_v26 = vxor.u32 2147483648, %v266_v32  ;;  %v514_v15 = vshrl.u32 %v1191_v41, 16  ;;  %v523_v62 = vadd.s32 %v522_v47, %v512_v45  ;;  %v471_v39 = vsel %vm465_vm14, %v1179_v55, %v470_v13 }
  0xf1   :  { %v401_v9 = vsel %vm280_vm2, %v400_v49, %v399_v20  ;;  %v1228_v36 = vadd.s32 %v517_v11, %v513_v18  ;;  %v590_v52 = vshrl.u32 %v589_v43, 23  ;;  %v275_v54 = vsel %vm273_vm9, %v274_v6, %v266_v32 }
  0xf2   :  { %v272_v28 = vsel %vm270_vm3, %v258_v30, %v271_v26  ;;  %v404_v31 = vsel %vm1202_vm4, %v938_v16, %v401_v9  ;;  %v524_v41 = vadd.s32 %v523_v62, %v514_v15  ;;  %v403_v58 = vsel %vm280_vm2, %v402_v23, %v1119_v21 }
  0xf3   :  { %v276_v59 = vsel %vm269_vm5, %v272_v28, %v275_v54  ;;  %v406_v60 = vmul.f32 %v404_v31, %v404_v31  ;;  %vm527_vm10 = vc.u32 %v1218_v17, %v1228_v36  ;;  %v787_v51 = vadd.s32 4294967169, %v590_v52 }
  0xf4   :  { %v277_v55 = vsel %vm267_vm7, nan, %v276_v59  ;;  %v528_v27 = vadd.s32 1, %v524_v41  ;;  %v525_v37 = vmul.u32 %v1141_v25, %v471_v39  ;;  %v586_v3 = vand.u32 2147483647, %v1181_v38 }
  0xf5   :  { %v740_v0 = vmul.f32 0.088388346, %v277_v55  ;;  %v407_v2 = vmul.f32 -0.001358992, %v406_v60  ;;  %v414_v1 = vmul.f32 -0.00019511016, %v406_v60  ;;  %vm421_vm0 = vweird.f32 %v938_v16 }
  0xf6   :  { %v529_v63 = vsel %vm527_vm10, %v528_v27, %v524_v41  ;;  %v596_v5 = vadd.s32 1, %v787_v51  ;;  %v405_v7 = vsel %vm1202_vm4, 0, %v403_v58  ;;  %v593_v25 = vand.u32 8388607, %v586_v3 }
  0xf7   :  { %744 = vst [vmem:[#allocation8] sm:$0xff] %v740_v0  ;;  %v408_v14 = vadd.f32 0.041655596, %v407_v2  ;;  %v415_v8 = vadd.f32 0.008332121, %v414_v1  ;;  %v530_v18 = vadd.s32 %v529_v63, %v525_v37  ;;  %v422_v4 = vand.u32 3, %v405_v7 }
  0xf8   :  { %vm597_vm11 = vcmp.gt.s32.totalorder %v596_v5, 0  ;;  %v594_v13 = vor.u32 8388608, %v593_v25  ;;  %v526_v2 = vadd.s32 %v1228_v36, %v1218_v17  ;;  %vm434_vm6 = vcmp.lt.s32.totalorder %v948_v33, 0 }
  0xf9   :  { %v409_v50 = vmul.f32 %v408_v14, %v406_v60  ;;  %v416_v21 = vmul.f32 %v415_v8, %v406_v60  ;;  %v531_v24 = vadd.s32 536870912, %v530_v18  ;;  %v598_v11 = vsel %vm597_vm11, %v596_v5, 0 }
  0xfa   :  { %v600_v10 = vand.u32 31, %v598_v11  ;;  %vm423_vm12 = vcmp.lt.s32.totalorder %v422_v4, 2  ;;  %vm424_vm13 = vcmp.eq.s32.totalorder %v422_v4, 0  ;;  %vm427_vm14 = vcmp.eq.s32.totalorder %v422_v4, 2 }
  0xfb   :  { %v410_v12 = vadd.f32 -0.4999988, %v409_v50  ;;  %v417_v19 = vadd.f32 -0.16666654, %v416_v21  ;;  %v1250_v30 = vshrl.u32 %v531_v24, 30  ;;  %v1255_v6 = vshrl.u32 %v598_v11, 5 }
  0xfc   :  { %v1252_v53 = vsub.s32 32, %v600_v10  ;;  %v603_v45 = vshll.u32 %v896_v40, %v600_v10  ;;  %v606_v62 = vshll.u32 %v897_v42, %v600_v10  ;;  %v609_v9 = vshll.u32 %v898_v44, %v600_v10 }
  0xfd   :  { %v411_v35 = vmul.f32 %v410_v12, %v406_v60  ;;  %v418_v56 = vmul.f32 %v417_v19, %v406_v60  ;;  %v533_v20 = vshll.u32 %v1250_v30, 30  ;;  %v612_v39 = vshll.u32 %v899_v46, %v600_v10 }
  0xfe   :  { %v604_v47 = vshrl.u32 %v897_v42, %v1252_v53  ;;  %v607_v49 = vshrl.u32 %v898_v44, %v1252_v53  ;;  %v610_v43 = vshrl.u32 %v899_v46, %v1252_v53  ;;  %v613_v52 = vshrl.u32 %v900_v48, %v1252_v53 }
  0xff   :  { %v412_v22 = vadd.f32 1.0, %v411_v35  ;;  %v419_v34 = vadd.f32 1.0, %v418_v56  ;;  %v534_v32 = vsub.s32 %v530_v18, %v533_v20  ;;  %v615_v41 = vshll.u32 %v900_v48, %v600_v10 }
 0x100   :  { %v616_v59 = vshrl.u32 %v901_v57, %v1252_v53  ;;  %v1272_v60 = vor.u32 %v604_v47, %v603_v45  ;;  %v1274_v51 = vor.u32 %v607_v49, %v606_v62  ;;  %v1276_v42 = vor.u32 %v610_v43, %v609_v9 }
 0x101   :  { %v420_v26 = vmul.f32 %v419_v34, %v404_v31  ;;  %v428_v23 = vxor.u32 2147483648, %v412_v22  ;;  %vm535_vm15 = vcmp.lt.s32.totalorder %v534_v32, 0  ;;  %v536_v15 = vsub.s32 0, %v534_v32 }
 0x102   :  { %v614_v55 = vor.u32 %v613_v52, %v612_v39  ;;  %v617_v58 = vor.u32 %v616_v59, %v615_v41  ;;  %v1282_v0 = vshll.u32 %v594_v13, 8  ;;  %vm618_vm1 = vcmp.lt.s32.totalorder %v1255_v6, 1 }
 0x103   :  { %v425_v28 = vxor.u32 2147483648, %v420_v26  ;;  %v537_v54 = vsel %vm535_vm15, %v536_v15, %v534_v32  ;;  %v429_v46 = vsel %vm427_vm14, %v428_v23, %v420_v26  ;;  %vm621_vm3 = vcmp.lt.s32.totalorder %v1255_v6, 4 }
 0x104   :  { %v538_v31 = vclz %v537_v54  ;;  %v626_v16 = vsel %vm618_vm1, %v1272_v60, %v1274_v51  ;;  %v627_v63 = vsel %vm621_vm3, %v614_v55, 920167782  ;;  %v630_v17 = vsel %vm618_vm1, %v1274_v51, %v1276_v42 }
 0x105   :  { %v426_v44 = vsel %vm424_vm13, %v412_v22, %v425_v28  ;;  %v631_v36 = vsel %vm621_vm3, %v617_v58, 1326507024  ;;  %vm620_vm4 = vcmp.lt.s32.totalorder %v1255_v6, 3  ;;  %v635_v14 = vand.u32 65535, %v1282_v0 }
 0x106   :  { %v430_v48 = vsel %vm423_vm12, %v426_v44, %v429_v46  ;;  %v785_v27 = vadd.s32 4294967294, %v538_v31  ;;  %vm619_vm5 = vcmp.lt.s32.totalorder %v1255_v6, 2  ;;  %v628_v18 = vsel %vm620_vm4, %v1276_v42, %v627_v63 }
 0x107   :  { %v431_v57 = vsel %vm421_vm0, nan, %v430_v48  ;;  %v632_v50 = vsel %vm620_vm4, %v614_v55, %v631_v36  ;;  %v629_v11 = vsel %vm619_vm5, %v626_v16, %v628_v18  ;;  %v636_v25 = vshrl.u32 %v1282_v0, 16 }
 0x108   :  { %v741_v1 = vmul.f32 0.088388346, %v431_v57  ;;  %vm786_vm2 = vcmp.lt.s32.totalorder %v785_v27, 0  ;;  %v633_v4 = vsel %vm619_vm5, %v630_v17, %v632_v50  ;;  %v660_v19 = vshrl.u32 %v629_v11, 16 }
 0x109   :  { %v541_v37 = vsel %vm786_vm2, 0, %v785_v27  ;;  %v637_v10 = vand.u32 65535, %v633_v4  ;;  %v638_v12 = vshrl.u32 %v633_v4, 16  ;;  %v659_v20 = vand.u32 65535, %v629_v11 }
 0x10a   :  { %745 = vst [vmem:[#allocation8 + $0x8] sm:$0xff] %v741_v1  ;;  %v542_v5 = vsub.s32 32, %v541_v37  ;;  %v546_v7 = vsub.s32 4294967266, %v541_v37  ;;  %v543_v8 = vshll.u32 %v534_v32, %v541_v37  ;;  %v662_v32 = vmul.u32 %v660_v19, %v635_v14 }
 0x10b   :  { %v640_v13 = vmul.u32 %v638_v12, %v635_v14  ;;  %v641_v22 = vmul.u32 %v637_v10, %v636_v25  ;;  %vm1316_vm7 = vcmp.le.f32.partialorder %v432_v29, 0.7853982  ;;  %v639_v47 = vmul.u32 %v637_v10, %v635_v14 }
 0x10c   :  { %v544_v21 = vshrl.u32 %v526_v2, %v542_v5  ;;  %v547_v24 = vadd.s32 127, %v546_v7  ;;  %v642_v49 = vmul.u32 %v638_v12, %v636_v25  ;;  %v663_v15 = vmul.u32 %v659_v20, %v636_v25 }
 0x10d   :  { %v643_v43 = vshll.u32 %v640_v13, 16  ;;  %v665_v62 = vshll.u32 %v662_v32, 16  ;;  %v645_v9 = vshll.u32 %v641_v22, 16  ;;  %v661_v52 = vmul.u32 %v659_v20, %v635_v14 }
 0x10e   :  { %v545_v35 = vor.u32 %v544_v21, %v543_v8  ;;  %v548_v56 = vshll.u32 %v547_v24, 23  ;;  %v664_v41 = vmul.u32 %v660_v19, %v636_v25  ;;  %v667_v59 = vshll.u32 %v663_v15, 16 }
 0x10f   :  { %vm647_vm8 = vc.u32 %v639_v47, %v643_v43  ;;  %v649_v39 = vadd.s32 %v643_v43, %v639_v47  ;;  %vm669_vm10 = vc.u32 %v661_v52, %v665_v62  ;;  %v671_v31 = vadd.s32 %v665_v62, %v661_v52 }
 0x110   :  { %v549_v34 = vor.u32 4788187, %v548_v56  ;;  %v552_v23 = vcvt.s32.f32 %v545_v35  ;;  %v648_v54 = vsel %vm647_vm8, 1, %v902_v61  ;;  %v623_v46 = vsel %vm621_vm3, %v1276_v42, 2102212464 }
 0x111   :  { %v650_v29 = vadd.s32 %v648_v54, %v642_v49  ;;  %vm651_vm9 = vc.u32 %v649_v39, %v645_v9  ;;  %v670_v58 = vsel %vm669_vm10, 1, %v902_v61  ;;  %v644_v48 = vshrl.u32 %v640_v13, 16 }
 0x112   :  { %v550_v26 = vand.u32 2147483647, %v549_v34  ;;  %v652_v55 = vsel %vm651_vm9, 1, %v902_v61  ;;  %v672_v57 = vadd.s32 %v670_v58, %v664_v41  ;;  %vm673_vm11 = vc.u32 %v671_v31, %v667_v59 }
 0x113   :  { %v654_v27 = vadd.s32 %v652_v55, %v650_v29  ;;  %v602_v1 = vshrl.u32 %v896_v40, %v1252_v53  ;;  %v646_v16 = vshrl.u32 %v641_v22, 16  ;;  %v674_v37 = vsel %vm673_vm11, 1, %v902_v61 }
 0x114   :  { %v553_v28 = vmul.f32 %v552_v23, %v550_v26  ;;  %v666_v17 = vshrl.u32 %v662_v32, 16  ;;  %v676_v36 = vadd.s32 %v674_v37, %v672_v57  ;;  %v624_v14 = vsel %vm620_vm4, %v1274_v51, %v623_v46 }
 0x115   :  { %v655_v63 = vadd.s32 %v654_v27, %v644_v48  ;;  %v622_v7 = vsel %vm618_vm1, %v602_v1, %v1272_v60  ;;  %v668_v53 = vshrl.u32 %v663_v15, 16  ;;  %v675_v50 = vadd.s32 %v671_v31, %v667_v59 }
 0x116   :  { %v554_v44 = vxor.u32 2147483648, %v553_v28  ;;  %v677_v8 = vadd.s32 %v676_v36, %v666_v17  ;;  %v556_v21 = vsub.s32 4, %v1250_v30  ;;  %v625_v24 = vsel %vm619_vm5, %v622_v7, %v624_v14 }
 0x117   :  { %v656_v40 = vadd.s32 %v655_v63, %v646_v16  ;;  %v679_v51 = vmul.u32 %v1282_v0, %v625_v24  ;;  %vm575_vm1 = vweird.f32 %v948_v33  ;;  %vm588_vm3 = vcmp.lt.s32.totalorder %v1181_v38, 0 }
 0x118   :  { %v555_v2 = vsel %vm434_vm6, %v554_v44, %v553_v28  ;;  %v678_v11 = vadd.s32 %v677_v8, %v668_v53  ;;  %v557_v19 = vsel %vm434_vm6, %v556_v21, %v1250_v30  ;;  %vm1353_vm4 = vcmp.le.f32.partialorder %v586_v3, 0.7853982 }
 0x119   :  { %v558_v42 = vsel %vm1316_vm7, %v948_v33, %v555_v2  ;;  %vm681_vm12 = vc.u32 %v656_v40, %v675_v50  ;;  %v559_v6 = vsel %vm1316_vm7, 0, %v557_v19  ;;  %v680_v44 = vadd.s32 %v675_v50, %v656_v40 }
 0x11a   :  { %v560_v5 = vmul.f32 %v558_v42, %v558_v42  ;;  %v682_v60 = vadd.s32 1, %v678_v11  ;;  %v576_v26 = vand.u32 3, %v559_v6  ;;  %vm729_vm8 = vweird.f32 %v1181_v38 }
 0x11c   :  { %v561_v61 = vmul.f32 -0.001358992, %v560_v5  ;;  %v568_v18 = vmul.f32 -0.00019511016, %v560_v5  ;;  %v683_v35 = vsel %vm681_vm12, %v682_v60, %v678_v11  ;;  %vm577_vm13 = vcmp.lt.s32.totalorder %v576_v26, 2 }
 0x11d   :  { %v684_v13 = vadd.s32 %v683_v35, %v679_v51  ;;  %vm578_vm14 = vcmp.eq.s32.totalorder %v576_v26, 0  ;;  %vm581_vm15 = vcmp.eq.s32.totalorder %v576_v26, 2 }
 0x11e   :  { %v562_v4 = vadd.f32 0.041655596, %v561_v61  ;;  %v569_v25 = vadd.f32 0.008332121, %v568_v18 }
 0x11f   :  { %v685_v32 = vadd.s32 536870912, %v684_v13 }
 0x120   :  { %v563_v10 = vmul.f32 %v562_v4, %v560_v5  ;;  %v570_v12 = vmul.f32 %v569_v25, %v560_v5 }
 0x121   :  { %v686_v43 = vshrl.u32 %v685_v32, 30 }
 0x122   :  { %v564_v56 = vadd.f32 -0.4999988, %v563_v10  ;;  %v571_v20 = vadd.f32 -0.16666654, %v570_v12 }
 0x123   :  { %v687_v15 = vshll.u32 %v686_v43, 30  ;;  %v710_v40 = vsub.s32 4, %v686_v43 }
 0x124   :  { %v565_v22 = vmul.f32 %v564_v56, %v560_v5  ;;  %v572_v34 = vmul.f32 %v571_v20, %v560_v5 }
 0x125   :  { %v688_v9 = vsub.s32 %v684_v13, %v687_v15  ;;  %v711_v50 = vsel %vm588_vm3, %v710_v40, %v686_v43 }
 0x126   :  { %v566_v47 = vadd.f32 1.0, %v565_v22  ;;  %v573_v49 = vadd.f32 1.0, %v572_v34  ;;  %v713_v3 = vsel %vm1353_vm4, 0, %v711_v50 }
 0x127   :  { %vm689_vm0 = vcmp.lt.s32.totalorder %v688_v9, 0  ;;  %v690_v45 = vsub.s32 0, %v688_v9  ;;  %v730_v10 = vand.u32 3, %v713_v3 }
 0x128   :  { %v574_v23 = vmul.f32 %v573_v49, %v558_v42  ;;  %v582_v0 = vxor.u32 2147483648, %v566_v47 }
 0x129   :  { %v691_v54 = vsel %vm689_vm0, %v690_v45, %v688_v9  ;;  %vm732_vm5 = vcmp.eq.s32.totalorder %v730_v10, 0  ;;  %vm735_vm6 = vcmp.eq.s32.totalorder %v730_v10, 2  ;;  %vm731_vm7 = vcmp.lt.s32.totalorder %v730_v10, 2 }
 0x12a   :  { %v579_v62 = vxor.u32 2147483648, %v574_v23  ;;  %v583_v39 = vsel %vm581_vm15, %v582_v0, %v574_v23  ;;  %v692_v59 = vclz %v691_v54 }
 0x12c   :  { %v580_v30 = vsel %vm578_vm14, %v566_v47, %v579_v62  ;;  %v788_v29 = vadd.s32 4294967294, %v692_v59 }
 0x12d   :  { %v584_v52 = vsel %vm577_vm13, %v580_v30, %v583_v39 }
 0x12e   :  { %v585_v28 = vsel %vm575_vm1, nan, %v584_v52  ;;  %vm789_vm2 = vcmp.lt.s32.totalorder %v788_v29, 0 }
 0x12f   :  { %v742_v41 = vmul.f32 0.088388346, %v585_v28  ;;  %v695_v31 = vsel %vm789_vm2, 0, %v788_v29 }
 0x130   :  { %v696_v46 = vsub.s32 32, %v695_v31  ;;  %v700_v55 = vsub.s32 4294967266, %v695_v31  ;;  %v697_v58 = vshll.u32 %v688_v9, %v695_v31 }
 0x131   :  { %746 = vst [vmem:[#allocation8 + $0x10] sm:$0xff] %v742_v41 }
 0x132   :  { %v698_v48 = vshrl.u32 %v680_v44, %v696_v46  ;;  %v701_v27 = vadd.s32 127, %v700_v55 }
 0x134   :  { %v699_v57 = vor.u32 %v698_v48, %v697_v58  ;;  %v702_v2 = vshll.u32 %v701_v27, 23 }
 0x136   :  { %v703_v1 = vor.u32 4788187, %v702_v2  ;;  %v706_v33 = vcvt.s32.f32 %v699_v57 }
 0x138   :  { %v704_v16 = vand.u32 2147483647, %v703_v1 }
 0x13a   :  { %v707_v37 = vmul.f32 %v706_v33, %v704_v16 }
 0x13c   :  { %v708_v42 = vxor.u32 2147483648, %v707_v37 }
 0x13e   :  { %v709_v17 = vsel %vm588_vm3, %v708_v42, %v707_v37 }
 0x13f   :  { %v712_v36 = vsel %vm1353_vm4, %v1181_v38, %v709_v17 }
 0x140   :  { %v714_v5 = vmul.f32 %v712_v36, %v712_v36 }
 0x142   :  { %v715_v7 = vmul.f32 -0.001358992, %v714_v5  ;;  %v722_v14 = vmul.f32 -0.00019511016, %v714_v5 }
 0x144   :  { %v716_v53 = vadd.f32 0.041655596, %v715_v7  ;;  %v723_v8 = vadd.f32 0.008332121, %v722_v14 }
 0x146   :  { %v717_v61 = vmul.f32 %v716_v53, %v714_v5  ;;  %v724_v18 = vmul.f32 %v723_v8, %v714_v5 }
 0x148   :  { %v718_v21 = vadd.f32 -0.4999988, %v717_v61  ;;  %v725_v24 = vadd.f32 -0.16666654, %v724_v18 }
 0x14a   :  { %v719_v11 = vmul.f32 %v718_v21, %v714_v5  ;;  %v726_v4 = vmul.f32 %v725_v24, %v714_v5 }
 0x14c   :  { %v720_v25 = vadd.f32 1.0, %v719_v11  ;;  %v727_v60 = vadd.f32 1.0, %v726_v4 }
 0x14e   :  { %v728_v12 = vmul.f32 %v727_v60, %v712_v36  ;;  %v736_v51 = vxor.u32 2147483648, %v720_v25 }
 0x150   :  { %v733_v19 = vxor.u32 2147483648, %v728_v12  ;;  %v737_v56 = vsel %vm735_vm6, %v736_v51, %v728_v12 }
 0x152   :  { %v734_v35 = vsel %vm732_vm5, %v720_v25, %v733_v19 }
 0x153   :  { %v738_v20 = vsel %vm731_vm7, %v734_v35, %v737_v56 }
 0x154   :  { %v739_v13 = vsel %vm729_vm8, nan, %v738_v20 }
 0x155   :  { %v743_v6 = vmul.f32 0.088388346, %v739_v13 }
 0x157   :  { %747 = vst [vmem:[#allocation8 + $0x18] sm:$0xff] %v743_v6 }
 0x158   :  { %760 = dma.vmem_to_hbm [thread:$0]  %s753_s26, 512, %s755_s29, [#allocation5], %s894_s24, %s894_s24, %s895_s25  }
 0x159   :  { %888 = dma.done.wait [#allocation5], 512  }
 0x15a   :  { %889 = vsyncadd [#allocation5], 4294966784 }
 0x15b   :  { %765 = vsyncpa [#allocation4], 1 }
 0x15c   :  { %766 = vsyncpa [#allocation7], 1 }
 0x15d   :  { %767 = vsyncpa [#allocation5], 1 }

</bundles_post_ra>
